<compile_context>
chip_gen: v5e
topology: v5e:2x2
jax: 0.10.0
libtpu: 0.0.40
codegen_flags: <defaults>
</compile_context>

<pallas_src>
import jax
import jax.numpy as jnp
from jax.experimental import pallas as pl
from jax.experimental.pallas import tpu as pltpu


def _round_up(x, m):
    return (x + m - 1) // m * m


def _vmem_capacity_bytes():
    try:
        return int(pltpu.get_tpu_info().vmem_capacity_bytes)
    except Exception:
        return 64 << 20  # conservative: v7x per-TensorCore VMEM


def _pad2d(a, rows, cols):
    r, c = a.shape
    if r == rows and c == cols:
        return a
    return jnp.pad(a, ((0, rows - r), (0, cols - c)))


# ----------------------------- kernels ---------------------------------------


def _expert_kernel_resident(x_ref, w1_ref, b1_ref, w2_ref, b2_ref, o_ref):
    # Grid = (token tiles,). Weights are full blocks with constant index_maps,
    # so they stay VMEM-resident after the first grid step.
    h = jnp.dot(x_ref[...], w1_ref[...], preferred_element_type=jnp.float32)
    h = jnp.maximum(h + b1_ref[...], 0.0)
    y = jnp.dot(h.astype(w2_ref.dtype), w2_ref[...],
                preferred_element_type=jnp.float32)
    o_ref[...] = (y + b2_ref[...]).astype(o_ref.dtype)


def _expert_kernel_streamed_f32out(x_ref, w1_ref, b1_ref, w2_ref, b2_ref, o_ref):
    # Grid = (token tiles, d_ff tiles). Output dtype is f32, so accumulate
    # directly into the resident output block (no scratch accumulator).
    f = pl.program_id(1)

    @pl.when(f == 0)
    def _():
        o_ref[...] = jnp.broadcast_to(b2_ref[...], o_ref.shape).astype(o_ref.dtype)

    h = jnp.dot(x_ref[...], w1_ref[...], preferred_element_type=jnp.float32)
    h = jnp.maximum(h + b1_ref[...], 0.0)
    o_ref[...] += jnp.dot(h.astype(w2_ref.dtype), w2_ref[...],
                          preferred_element_type=jnp.float32)


def _expert_kernel_streamed_acc(x_ref, w1_ref, b1_ref, w2_ref, b2_ref, o_ref,
                                acc_ref):
    # Grid = (token tiles, d_ff tiles). Non-f32 output: accumulate in f32 scratch,
    # initialized with b2 (saves a zero-fill + epilogue add), cast on finalize.
    f = pl.program_id(1)

    @pl.when(f == 0)
    def _():
        acc_ref[...] = jnp.broadcast_to(b2_ref[...], acc_ref.shape).astype(jnp.float32)

    h = jnp.dot(x_ref[...], w1_ref[...], preferred_element_type=jnp.float32)
    h = jnp.maximum(h + b1_ref[...], 0.0)
    acc_ref[...] += jnp.dot(h.astype(w2_ref.dtype), w2_ref[...],
                            preferred_element_type=jnp.float32)

    @pl.when(f == pl.num_programs(1) - 1)
    def _():
        o_ref[...] = acc_ref[...].astype(o_ref.dtype)


# ----------------------------- wrapper ----------------------------------------


def expert_forward(x, w1, b1, w2, b2, *, tile_n=None, tile_ff=None):
    """Fused Linear-ReLU-Linear.  x: (..., d_model) -> (..., output_dim).

    w1: (d_model, d_ff), b1: (d_ff,), w2: (d_ff, output_dim), b2: (output_dim,)
    (weights are the transpose of PyTorch nn.Linear's (out, in) layout).
    """
    orig_shape = x.shape
    d_model = orig_shape[-1]
    d_ff = w1.shape[1]
    output_dim = w2.shape[1]

    x2d = x.reshape(-1, d_model)
    n = x2d.shape[0]

    x_isz = jnp.dtype(x.dtype).itemsize
    w_isz = jnp.dtype(w1.dtype).itemsize
    out_dtype = x.dtype
    out_isz = jnp.dtype(out_dtype).itemsize

    vmem_cap = _vmem_capacity_bytes()
    big_vmem = vmem_cap >= (100 << 20)                 # v5e / v6e (128 MiB parts)
    budget = min(int(vmem_cap * 0.8), 100 << 20)       # what we let tiles consume
    vmem_cap_limit = (100 << 20) if big_vmem else int(vmem_cap * 0.85)

    # ---- lane-aligned padded feature dims (contraction dims + output lanes) ----
    d_model_p = _round_up(d_model, 128)
    d_ff_p = _round_up(d_ff, 128)
    output_dim_p = _round_up(output_dim, 128)

    # ---- token tile: MXU-friendly granule, no token-axis padding of x --------
    if tile_n is None:
        tile_n = 1024 if big_vmem else 512
    tile_n = max(8, min(tile_n, _round_up(n, 256)))

    # ------------------------------------------------------------------ paths --
    # Resident path budget: double-buffered x/out tiles + (conservatively)
    # double-buffered full weights + f32 intermediates inside the body.
    def resident_need(tn):
        return (2 * tn * d_model_p * x_isz
                + 2 * d_model_p * d_ff_p * w_isz + 2 * 8 * d_ff_p * w_isz
                + 2 * d_ff_p * output_dim_p * w_isz + 2 * 8 * output_dim_p * w_isz
                + 2 * tn * output_dim_p * out_isz
                + tn * d_ff_p * 4            # f32 hidden activation
                + tn * output_dim_p * 4)     # f32 second matmul result

    use_resident = False
    for cand in (tile_n, 256, 128):
        if cand <= tile_n and resident_need(cand) <= budget:
            tile_n = cand
            use_resident = True
            break

    n_tiles = pl.cdiv(n, tile_n)

    # --------------------------------------------------------------------------
    if use_resident:
        xp = _pad2d(x2d, n, d_model_p)
        w1p = _pad2d(w1, d_model_p, d_ff_p)
        b1p = _pad2d(b1.reshape(1, d_ff), 1, d_ff_p)
        w2p = _pad2d(w2, d_ff_p, output_dim_p)
        b2p = _pad2d(b2.reshape(1, output_dim), 1, output_dim_p)

        need = resident_need(tile_n)
        vmem_limit = min(vmem_cap_limit, max(int(need * 1.25) + (2 << 20), 32 << 20))

        cost = pl.CostEstimate(
            flops=2 * n * d_model * d_ff + 2 * n * d_ff * output_dim,
            transcendentals=0,
            bytes_accessed=int(n * d_model_p * x_isz
                               + (w1p.size + b1p.size + w2p.size + b2p.size) * w_isz
                               + n * output_dim_p * out_isz),
        )

        out = pl.pallas_call(
            _expert_kernel_resident,
            out_shape=jax.ShapeDtypeStruct((n, output_dim_p), out_dtype),
            grid_spec=pltpu.PrefetchScalarGridSpec(
                num_scalar_prefetch=0,
                grid=(n_tiles,),
                in_specs=[
                    pl.BlockSpec((tile_n, d_model_p), lambda i: (i, 0)),        # x
                    pl.BlockSpec((d_model_p, d_ff_p), lambda i: (0, 0)),        # W1 (resident)
                    pl.BlockSpec((1, d_ff_p), lambda i: (0, 0)),                # b1 (resident)
                    pl.BlockSpec((d_ff_p, output_dim_p), lambda i: (0, 0)),     # W2 (resident)
                    pl.BlockSpec((1, output_dim_p), lambda i: (0, 0)),          # b2 (resident)
                ],
                out_specs=pl.BlockSpec((tile_n, output_dim_p), lambda i: (i, 0)),
            ),
            compiler_params=pltpu.CompilerParams(
                dimension_semantics=("parallel",),
                vmem_limit_bytes=vmem_limit,
            ),
            cost_estimate=cost,
        )(xp, w1p, b1p, w2p, b2p)

    else:
        # ---------------- streamed-weights fallback (d_ff reduction axis) ------
        use_scratch = out_dtype != jnp.float32

        if tile_ff is None:
            tile_ff = 1024 if big_vmem else 512
        tile_ff = max(128, min(tile_ff, d_ff_p))

        def streamed_need(tn, tf):
            need = (2 * tn * d_model_p * x_isz
                    + 2 * d_model_p * tf * w_isz + 2 * 8 * tf * w_isz
                    + 2 * tf * output_dim_p * w_isz + 2 * 8 * output_dim_p * w_isz
                    + 2 * tn * output_dim_p * out_isz
                    + tn * tf * 4)                       # f32 hidden activation
            if use_scratch:
                need += tn * output_dim_p * 4            # f32 accumulator scratch
            return need

        # Shrink tiles until the double-buffered footprint fits the budget.
        while streamed_need(tile_n, tile_ff) > budget:
            if tile_ff > 256:
                tile_ff //= 2
            elif tile_n > 256:
                tile_n //= 2
            elif tile_ff > 128:
                tile_ff //= 2
            elif tile_n > 8:
                tile_n = max(tile_n // 2, 8)
            else:
                break

        n_tiles = pl.cdiv(n, tile_n)
        d_ff_p = _round_up(d_ff, tile_ff)   # zero padding makes ReLU chunk exact
        ff_tiles = d_ff_p // tile_ff

        xp = _pad2d(x2d, n, d_model_p)
        w1p = _pad2d(w1, d_model_p, d_ff_p)
        b1p = _pad2d(b1.reshape(1, d_ff), 1, d_ff_p)
        w2p = _pad2d(w2, d_ff_p, output_dim_p)
        b2p = _pad2d(b2.reshape(1, output_dim), 1, output_dim_p)

        need = streamed_need(tile_n, tile_ff)
        vmem_limit = min(vmem_cap_limit, max(int(need * 1.25) + (2 << 20), 32 << 20))

        cost = pl.CostEstimate(
            flops=2 * n * d_model * d_ff + 2 * n * d_ff * output_dim,
            transcendentals=0,
            bytes_accessed=int(n * d_model_p * x_isz
                               + int(n_tiles) * (w1p.size + b1p.size
                                                 + w2p.size + b2p.size) * w_isz
                               + n * output_dim_p * out_isz),
        )

        kernel = (_expert_kernel_streamed_acc if use_scratch
                  else _expert_kernel_streamed_f32out)
        scratch = ([pltpu.VMEM((tile_n, output_dim_p), jnp.float32)]
                   if use_scratch else [])

        out = pl.pallas_call(
            kernel,
            out_shape=jax.ShapeDtypeStruct((n, output_dim_p), out_dtype),
            grid_spec=pltpu.PrefetchScalarGridSpec(
                num_scalar_prefetch=0,
                grid=(n_tiles, ff_tiles),
                in_specs=[
                    pl.BlockSpec((tile_n, d_model_p), lambda i, f: (i, 0)),      # x
                    pl.BlockSpec((d_model_p, tile_ff), lambda i, f: (0, f)),     # W1
                    pl.BlockSpec((1, tile_ff), lambda i, f: (0, f)),             # b1
                    pl.BlockSpec((tile_ff, output_dim_p), lambda i, f: (f, 0)),  # W2
                    pl.BlockSpec((1, output_dim_p), lambda i, f: (0, 0)),        # b2
                ],
                out_specs=pl.BlockSpec((tile_n, output_dim_p), lambda i, f: (i, 0)),
                scratch_shapes=scratch,
            ),
            compiler_params=pltpu.CompilerParams(
                dimension_semantics=("parallel", "arbitrary"),
                vmem_limit_bytes=vmem_limit,
            ),
            cost_estimate=cost,
        )(xp, w1p, b1p, w2p, b2p)

    out = out[:, :output_dim]
    return out.reshape(*orig_shape[:-1], output_dim)


if __name__ == "__main__":
    # Small shapes consistent with the module: tokens = batch*seq, d_model=32,
    # d_ff=64, output_dim=32.
    batch, seq = 2, 8
    d_model, d_ff, output_dim = 32, 64, 32

    key = jax.random.PRNGKey(0)
    kx, k1, k2, k3, k4 = jax.random.split(key, 5)

    x = jax.random.normal(kx, (batch, seq, d_model), dtype=jnp.float32)

    # Deterministic parameter init (roughly like nn.Linear's uniform init),
    # stored as (in, out) = transpose of PyTorch's nn.Linear weight.
    limit1 = 1.0 / jnp.sqrt(d_model)
    limit2 = 1.0 / jnp.sqrt(d_ff)
    w1 = jax.random.uniform(k1, (d_model, d_ff), jnp.float32, -limit1, limit1)
    b1 = jax.random.uniform(k2, (d_ff,), jnp.float32, -limit1, limit1)
    w2 = jax.random.uniform(k3, (d_ff, output_dim), jnp.float32, -limit2, limit2)
    b2 = jax.random.uniform(k4, (output_dim,), jnp.float32, -limit2, limit2)

    out = expert_forward(x, w1, b1, w2, b2)
    out = jax.block_until_ready(out)

    # Pure-JAX reference of the same forward pass.
    ref = jnp.maximum(x @ w1 + b1, 0.0) @ w2 + b2
    assert out.shape == (batch, seq, output_dim)
    assert jnp.allclose(out, ref, atol=1e-5, rtol=1e-5)

    print("KERNEL_OK")
</pallas_src>

<mosaic_0001>
module attributes {stable_mosaic.version = 11 : i64} {
  func.func @_expert_kernel_resident(%arg0: i32, %arg1: memref<256x128xf32, #tpu.memory_space<vmem>>, %arg2: memref<128x128xf32, #tpu.memory_space<vmem>>, %arg3: memref<1x128xf32, #tpu.memory_space<vmem>>, %arg4: memref<128x128xf32, #tpu.memory_space<vmem>>, %arg5: memref<1x128xf32, #tpu.memory_space<vmem>>, %arg6: memref<256x128xf32, #tpu.memory_space<vmem>>) attributes {dimension_semantics = [#tpu.dimension_semantics<parallel>], iteration_bounds = array<i64: 1>, scalar_prefetch = 0 : i64, scratch_operands = 0 : i64, tpu.core_type = #tpu.core_type<tc>, window_params = [{transform_indices = @transform_0, window_bounds = array<i64: 256, 128>}, {pipeline_mode = #tpu.pipeline_mode<synchronous>, transform_indices = @transform_1, window_bounds = array<i64: 128, 128>}, {pipeline_mode = #tpu.pipeline_mode<synchronous>, transform_indices = @transform_2, window_bounds = array<i64: 1, 128>}, {pipeline_mode = #tpu.pipeline_mode<synchronous>, transform_indices = @transform_3, window_bounds = array<i64: 128, 128>}, {pipeline_mode = #tpu.pipeline_mode<synchronous>, transform_indices = @transform_4, window_bounds = array<i64: 1, 128>}, {transform_indices = @transform_5, window_bounds = array<i64: 256, 128>}]} {
    %c0 = arith.constant 0 : index
    %c0_0 = arith.constant 0 : index
    %0 = vector.load %arg1[%c0, %c0_0] : memref<256x128xf32, #tpu.memory_space<vmem>>, vector<256x128xf32>
    %c0_1 = arith.constant 0 : index
    %c0_2 = arith.constant 0 : index
    %1 = vector.load %arg2[%c0_1, %c0_2] : memref<128x128xf32, #tpu.memory_space<vmem>>, vector<128x128xf32>
    %cst = arith.constant dense<0.000000e+00> : vector<256x128xf32>
    %2 = tpu.matmul %0, %1, %cst {dimension_numbers = #tpu.dot_dimension_numbers<[1], [0], [0], [1], [0, 0, 1, 1], [], []>} : vector<256x128xf32>, vector<128x128xf32>, vector<256x128xf32> -> vector<256x128xf32>
    %c0_3 = arith.constant 0 : index
    %c0_4 = arith.constant 0 : index
    %3 = vector.load %arg3[%c0_3, %c0_4] : memref<1x128xf32, #tpu.memory_space<vmem>>, vector<1x128xf32>
    %4 = vector.broadcast %3 : vector<1x128xf32> to vector<256x128xf32>
    %5 = arith.addf %2, %4 : vector<256x128xf32>
    %cst_5 = arith.constant 0.000000e+00 : f32
    %6 = vector.broadcast %cst_5 : f32 to vector<256x128xf32>
    %7 = arith.maximumf %5, %6 : vector<256x128xf32>
    %c0_6 = arith.constant 0 : index
    %c0_7 = arith.constant 0 : index
    %8 = vector.load %arg4[%c0_6, %c0_7] : memref<128x128xf32, #tpu.memory_space<vmem>>, vector<128x128xf32>
    %cst_8 = arith.constant dense<0.000000e+00> : vector<256x128xf32>
    %9 = tpu.matmul %7, %8, %cst_8 {dimension_numbers = #tpu.dot_dimension_numbers<[1], [0], [0], [1], [0, 0, 1, 1], [], []>} : vector<256x128xf32>, vector<128x128xf32>, vector<256x128xf32> -> vector<256x128xf32>
    %c0_9 = arith.constant 0 : index
    %c0_10 = arith.constant 0 : index
    %10 = vector.load %arg5[%c0_9, %c0_10] : memref<1x128xf32, #tpu.memory_space<vmem>>, vector<1x128xf32>
    %11 = vector.broadcast %10 : vector<1x128xf32> to vector<256x128xf32>
    %12 = arith.addf %9, %11 : vector<256x128xf32>
    %c0_11 = arith.constant 0 : index
    %c0_12 = arith.constant 0 : index
    %13 = vector.load %arg6[%c0_11, %c0_12] : memref<256x128xf32, #tpu.memory_space<vmem>>, vector<256x128xf32>
    tpu.vector_store %arg6[%c0_11, %c0_12], %12 {strides = array<i32>} : memref<256x128xf32, #tpu.memory_space<vmem>>, vector<256x128xf32>,
    return
  }
  func.func @transform_0(%arg0: i32) -> (i32, i32) {
    %c0_i32 = arith.constant 0 : i32
    %c0_i32_0 = arith.constant 0 : i32
    return %arg0, %c0_i32 : i32, i32
  }
  func.func @transform_1(%arg0: i32) -> (i32, i32) {
    %c0_i32 = arith.constant 0 : i32
    %c0_i32_0 = arith.constant 0 : i32
    %c0_i32_1 = arith.constant 0 : i32
    return %c0_i32, %c0_i32_0 : i32, i32
  }
  func.func @transform_2(%arg0: i32) -> (i32, i32) {
    %c0_i32 = arith.constant 0 : i32
    %c0_i32_0 = arith.constant 0 : i32
    %c0_i32_1 = arith.constant 0 : i32
    return %c0_i32, %c0_i32_0 : i32, i32
  }
  func.func @transform_3(%arg0: i32) -> (i32, i32) {
    %c0_i32 = arith.constant 0 : i32
    %c0_i32_0 = arith.constant 0 : i32
    %c0_i32_1 = arith.constant 0 : i32
    return %c0_i32, %c0_i32_0 : i32, i32
  }
  func.func @transform_4(%arg0: i32) -> (i32, i32) {
    %c0_i32 = arith.constant 0 : i32
    %c0_i32_0 = arith.constant 0 : i32
    %c0_i32_1 = arith.constant 0 : i32
    return %c0_i32, %c0_i32_0 : i32, i32
  }
  func.func @transform_5(%arg0: i32) -> (i32, i32) {
    %c0_i32 = arith.constant 0 : i32
    %c0_i32_0 = arith.constant 0 : i32
    return %arg0, %c0_i32 : i32, i32
  }
}

</mosaic_0001>

<bundles_post_ra>
// kernel: tpu_custom_call.1
= control target key start
LH: loop header
LB: loop body
LE: loop exit
PB: predicated region body
PF: predicated region fallthrough
CT: control target
= control target key end

     0   :  { %10 = vsyncpa [#allocation3], 0  ;;  %s726_s0 = inlined_call_operand.hbm [shape: f32[16,128], index: 0, kind: input, shape index: {}]   ;;  %s727_s1 = inlined_call_operand.hbm [shape: f32[128,128], index: 1, kind: input, shape index: {}]   ;;  %s728_s2 = inlined_call_operand.vmem [shape: f32[1,128], index: 2, kind: input, shape index: {}]   ;;  %s729_s3 = inlined_call_operand.hbm [shape: f32[128,128], index: 3, kind: input, shape index: {}]   ;;  %s730_s4 = inlined_call_operand.vmem [shape: f32[1,128], index: 4, kind: input, shape index: {}]   ;;  %s731_s5 = inlined_call_operand.hbm [shape: f32[16,128], index: 5, kind: output, shape index: {}]  }
   0x1   :  { %11 = vsyncpa [#allocation6], 0 }
   0x2   :  { %12 = vsyncpa [#allocation4], 0 }
   0x3   :  { %16 = vsyncadd [#allocation3], 3840  ;;  %s30_s20 = sshll.u32 %s727_s1, 4  ;;  %s592_s21 = smov [#allocation5]   ;;  %s31_s20 = int_to_ptr.hbm [resolvable:$true] %s30_s20 }
   0x4   :  { %s32_s22 = sshll.u32 %s592_s21, 4  ;;  %s17_s25 = sshll.u32 %s726_s0, 4  ;;  %s33_s22 = int_to_ptr.vmem [resolvable:$true] %s32_s22  ;;  %s18_s25 = int_to_ptr.hbm [resolvable:$true] %s17_s25 }
   0x5   :  { %s593_s26 = smov 128   ;;  %s594_s27 = smov 8  }
   0x6   :  { %38 = dma.hbm_to_vmem [thread:$0]  %s31_s20, 2048, %s33_s22, [#allocation6], %s593_s26, %s593_s26, %s594_s27  }
   0x7   :  { %s595_s28 = smov [#allocation2]   ;;  %s45_s1 = sshll.u32 %s729_s3, 4  ;;  %s46_s1 = int_to_ptr.hbm [resolvable:$true] %s45_s1 }
   0x8   :  { %s19_s29 = sshll.u32 %s595_s28, 4  ;;  %s596_s0 = smov [#allocation7]   ;;  %s20_s29 = int_to_ptr.vmem [resolvable:$true] %s19_s29 }
   0x9   :  { %25 = dma.hbm_to_vmem [thread:$0]  %s18_s25, 256, %s20_s29, [#allocation3], %s593_s26, %s593_s26, %s594_s27  }
   0xa   :  { %s47_s7 = sshll.u32 %s596_s0, 4  ;;  %s48_s7 = int_to_ptr.vmem [resolvable:$true] %s47_s7 }
   0xb   :  { %53 = dma.hbm_to_vmem [thread:$0]  %s46_s1, 2048, %s48_s7, [#allocation6], %s593_s26, %s593_s26, %s594_s27  }
   0xc   :  { %586 = dma.done.wait [#allocation3], 4096  }
   0xd   :  { %587 = vsyncadd [#allocation3], 4294963200 }
   0xe   :  { %588 = dma.done.wait [#allocation6], 4096  }
   0xf   :  { %589 = vsyncadd [#allocation6], 4294963200  ;;  %v115_v0 = vld [vmem:[#allocation5 + $0x78] sm:$0xff]  ;;  %v114_v1 = vld [vmem:[#allocation5 + $0x70] sm:$0xff] }
  0x10   :  { %450 = vmatpush.msra.mxu2 %v115_v0  ;;  %120 = vmatpush.msra.mxu0 %v115_v0  ;;  %v113_v2 = vld [vmem:[#allocation5 + $0x68] sm:$0xff]  ;;  %v112_v3 = vld [vmem:[#allocation5 + $0x60] sm:$0xff]  ;;  %v111_v4 = vld [vmem:[#allocation5 + $0x58] sm:$0xff] }
  0x11   :  { %v110_v5 = vld [vmem:[#allocation5 + $0x50] sm:$0xff]  ;;  %v109_v6 = vld [vmem:[#allocation5 + $0x48] sm:$0xff]  ;;  %v108_v7 = vld [vmem:[#allocation5 + $0x40] sm:$0xff] }
  0x12   :  { %451 = vmatpush.msra.mxu2 %v114_v1  ;;  %121 = vmatpush.msra.mxu0 %v114_v1  ;;  %v107_v8 = vld [vmem:[#allocation5 + $0x38] sm:$0xff]  ;;  %v106_v9 = vld [vmem:[#allocation5 + $0x30] sm:$0xff]  ;;  %v105_v10 = vld [vmem:[#allocation5 + $0x28] sm:$0xff] }
  0x13   :  { %v104_v11 = vld [vmem:[#allocation5 + $0x20] sm:$0xff]  ;;  %v103_v12 = vld [vmem:[#allocation5 + $0x18] sm:$0xff]  ;;  %v102_v13 = vld [vmem:[#allocation5 + $0x10] sm:$0xff] }
  0x14   :  { %452 = vmatpush.msra.mxu2 %v113_v2  ;;  %122 = vmatpush.msra.mxu0 %v113_v2  ;;  %v101_v14 = vld [vmem:[#allocation5 + $0x8] sm:$0xff]  ;;  %v100_v15 = vld [vmem:[#allocation5] sm:$0xff]  ;;  %v86_v20 = vld [vmem:[#allocation2 + $0x90] sm:$0xff] }
  0x15   :  { %v84_v16 = vld [vmem:[#allocation2 + $0x80] sm:$0xff]  ;;  %v85_v18 = vld [vmem:[#allocation2 + $0x88] sm:$0xff]  ;;  %v70_v21 = vld [vmem:[#allocation2 + $0x10] sm:$0xff] }
  0x16   :  { %453 = vmatpush.msra.mxu2 %v112_v3  ;;  %123 = vmatpush.msra.mxu0 %v112_v3  ;;  %v68_v17 = vld [vmem:[#allocation2] sm:$0xff]  ;;  %v69_v19 = vld [vmem:[#allocation2 + $0x8] sm:$0xff]  ;;  %v87_v22 = vld [vmem:[#allocation2 + $0x98] sm:$0xff] }
  0x17   :  { %v71_v23 = vld [vmem:[#allocation2 + $0x18] sm:$0xff]  ;;  %v88_v24 = vld [vmem:[#allocation2 + $0xa0] sm:$0xff]  ;;  %v89_v26 = vld [vmem:[#allocation2 + $0xa8] sm:$0xff] }
  0x18   :  { %454 = vmatpush.msra.mxu2 %v111_v4  ;;  %124 = vmatpush.msra.mxu0 %v111_v4  ;;  %v72_v25 = vld [vmem:[#allocation2 + $0x20] sm:$0xff]  ;;  %v73_v27 = vld [vmem:[#allocation2 + $0x28] sm:$0xff]  ;;  %v90_v28 = vld [vmem:[#allocation2 + $0xb0] sm:$0xff] }
  0x19   :  { %v74_v29 = vld [vmem:[#allocation2 + $0x30] sm:$0xff]  ;;  %v91_v30 = vld [vmem:[#allocation2 + $0xb8] sm:$0xff]  ;;  %v92_v32 = vld [vmem:[#allocation2 + $0xc0] sm:$0xff] }
  0x1a   :  { %455 = vmatpush.msra.mxu2 %v110_v5  ;;  %125 = vmatpush.msra.mxu0 %v110_v5  ;;  %v75_v31 = vld [vmem:[#allocation2 + $0x38] sm:$0xff]  ;;  %v76_v33 = vld [vmem:[#allocation2 + $0x40] sm:$0xff]  ;;  %v93_v34 = vld [vmem:[#allocation2 + $0xc8] sm:$0xff] }
  0x1b   :  { %v77_v35 = vld [vmem:[#allocation2 + $0x48] sm:$0xff]  ;;  %v280_v36 = vld [vmem:[#allocation7 + $0x78] sm:$0xff]  ;;  %v279_v37 = vld [vmem:[#allocation7 + $0x70] sm:$0xff] }
  0x1c   :  { %456 = vmatpush.msra.mxu2 %v109_v6  ;;  %126 = vmatpush.msra.mxu0 %v109_v6  ;;  %v278_v38 = vld [vmem:[#allocation7 + $0x68] sm:$0xff]  ;;  %v277_v39 = vld [vmem:[#allocation7 + $0x60] sm:$0xff]  ;;  %v94_v40 = vld [vmem:[#allocation2 + $0xd0] sm:$0xff] }
  0x1d   :  { %466 = vmatpush.msra.mxu3 %v280_v36  ;;  %285 = vmatpush.msra.mxu1 %v280_v36  ;;  %v78_v41 = vld [vmem:[#allocation2 + $0x50] sm:$0xff]  ;;  %v276_v42 = vld [vmem:[#allocation7 + $0x58] sm:$0xff]  ;;  %v274_v44 = vld [vmem:[#allocation7 + $0x48] sm:$0xff] }
  0x1e   :  { %457 = vmatpush.msra.mxu2 %v108_v7  ;;  %127 = vmatpush.msra.mxu0 %v108_v7  ;;  %v275_v43 = vld [vmem:[#allocation7 + $0x50] sm:$0xff]  ;;  %v273_v45 = vld [vmem:[#allocation7 + $0x40] sm:$0xff]  ;;  %v95_v46 = vld [vmem:[#allocation2 + $0xd8] sm:$0xff] }
  0x1f   :  { %467 = vmatpush.msra.mxu3 %v279_v37  ;;  %286 = vmatpush.msra.mxu1 %v279_v37  ;;  %v79_v47 = vld [vmem:[#allocation2 + $0x58] sm:$0xff]  ;;  %v271_v49 = vld [vmem:[#allocation7 + $0x30] sm:$0xff]  ;;  %v270_v50 = vld [vmem:[#allocation7 + $0x28] sm:$0xff] }
  0x20   :  { %458 = vmatpush.msra.mxu2 %v107_v8  ;;  %128 = vmatpush.msra.mxu0 %v107_v8  ;;  %v272_v48 = vld [vmem:[#allocation7 + $0x38] sm:$0xff]  ;;  %v269_v51 = vld [vmem:[#allocation7 + $0x20] sm:$0xff]  ;;  %v267_v55 = vld [vmem:[#allocation7 + $0x10] sm:$0xff] }
  0x21   :  { %468 = vmatpush.msra.mxu3 %v278_v38  ;;  %287 = vmatpush.msra.mxu1 %v278_v38  ;;  %v96_v52 = vld [vmem:[#allocation2 + $0xe0] sm:$0xff]  ;;  %v268_v54 = vld [vmem:[#allocation7 + $0x18] sm:$0xff]  ;;  %v266_v56 = vld [vmem:[#allocation7 + $0x8] sm:$0xff] }
  0x22   :  { %459 = vmatpush.msra.mxu2 %v106_v9  ;;  %129 = vmatpush.msra.mxu0 %v106_v9  ;;  %v80_v53 = vld [vmem:[#allocation2 + $0x60] sm:$0xff]  ;;  %v97_v57 = vld [vmem:[#allocation2 + $0xe8] sm:$0xff]  ;;  %v98_v60 = vld [vmem:[#allocation2 + $0xf0] sm:$0xff] }
  0x23   :  { %469 = vmatpush.msra.mxu3 %v277_v39  ;;  %288 = vmatpush.msra.mxu1 %v277_v39  ;;  %v81_v58 = vld [vmem:[#allocation2 + $0x68] sm:$0xff]  ;;  %v265_v59 = vld [vmem:[#allocation7] sm:$0xff]  ;;  %v82_v61 = vld [vmem:[#allocation2 + $0x70] sm:$0xff] }
  0x24   :  { %460 = vmatpush.msra.mxu2 %v105_v10  ;;  %130 = vmatpush.msra.mxu0 %v105_v10  ;;  %v99_v62 = vld [vmem:[#allocation2 + $0xf8] sm:$0xff]  ;;  %v649_v0 = vld [vmem:[%s728_s2] ss:$0 sm:$0xff] }
  0x25   :  { %470 = vmatpush.msra.mxu3 %v276_v42  ;;  %289 = vmatpush.msra.mxu1 %v276_v42  ;;  %v83_v63 = vld [vmem:[#allocation2 + $0x78] sm:$0xff] }
  0x26   :  { %461 = vmatpush.msra.mxu2 %v104_v11  ;;  %131 = vmatpush.msra.mxu0 %v104_v11 }
  0x27   :  { %471 = vmatpush.msra.mxu3 %v275_v43  ;;  %290 = vmatpush.msra.mxu1 %v275_v43 }
  0x28   :  { %462 = vmatpush.msra.mxu2 %v103_v12  ;;  %132 = vmatpush.msra.mxu0 %v103_v12 }
  0x29   :  { %472 = vmatpush.msra.mxu3 %v274_v44  ;;  %291 = vmatpush.msra.mxu1 %v274_v44 }
  0x2a   :  { %463 = vmatpush.msra.mxu2 %v102_v13  ;;  %133 = vmatpush.msra.mxu0 %v102_v13 }
  0x2b   :  { %473 = vmatpush.msra.mxu3 %v273_v45  ;;  %292 = vmatpush.msra.mxu1 %v273_v45 }
  0x2c   :  { %464 = vmatpush.msra.mxu2 %v101_v14  ;;  %134 = vmatpush.msra.mxu0 %v101_v14 }
  0x2d   :  { %474 = vmatpush.msra.mxu3 %v272_v48  ;;  %293 = vmatpush.msra.mxu1 %v272_v48 }
  0x2e   :  { %465 = vmatpush.msra.mxu2 %v100_v15  ;;  %135 = vmatpush.msra.mxu0 %v100_v15 }
  0x2f   :  { %184 = vmatmul.f32.vlgmr.msra.gmra.mxu2 %v84_v16  ;;  %136 = vmatmul.f32.vlgmr.msra.gmra.mxu0 %v68_v17 }
  0x30   :  { %475 = vmatpush.msra.mxu3 %v271_v49  ;;  %294 = vmatpush.msra.mxu1 %v271_v49 }
  0x32   :  { %476 = vmatpush.msra.mxu3 %v270_v50  ;;  %295 = vmatpush.msra.mxu1 %v270_v50 }
  0x34   :  { %477 = vmatpush.msra.mxu3 %v269_v51  ;;  %296 = vmatpush.msra.mxu1 %v269_v51 }
  0x36   :  { %478 = vmatpush.msra.mxu3 %v268_v54  ;;  %297 = vmatpush.msra.mxu1 %v268_v54 }
  0x37   :  { %187 = vmatmul.f32.gmra.mxu2 %v85_v18  ;;  %139 = vmatmul.f32.gmra.mxu0 %v69_v19 }
  0x38   :  { %479 = vmatpush.msra.mxu3 %v267_v55  ;;  %298 = vmatpush.msra.mxu1 %v267_v55 }
  0x3a   :  { %480 = vmatpush.msra.mxu3 %v266_v56  ;;  %299 = vmatpush.msra.mxu1 %v266_v56 }
  0x3c   :  { %481 = vmatpush.msra.mxu3 %v265_v59  ;;  %300 = vmatpush.msra.mxu1 %v265_v59 }
  0x3f   :  { %190 = vmatmul.f32.gmra.mxu2 %v86_v20  ;;  %142 = vmatmul.f32.gmra.mxu0 %v70_v21 }
  0x47   :  { %193 = vmatmul.f32.gmra.mxu2 %v87_v22  ;;  %145 = vmatmul.f32.gmra.mxu0 %v71_v23 }
  0x4f   :  { %196 = vmatmul.f32.gmra.mxu2 %v88_v24  ;;  %148 = vmatmul.f32.gmra.mxu0 %v72_v25 }
  0x57   :  { %199 = vmatmul.f32.gmra.mxu2 %v89_v26  ;;  %151 = vmatmul.f32.gmra.mxu0 %v73_v27 }
  0x5f   :  { %202 = vmatmul.f32.gmra.mxu2 %v90_v28  ;;  %154 = vmatmul.f32.gmra.mxu0 %v74_v29 }
  0x67   :  { %205 = vmatmul.f32.gmra.mxu2 %v91_v30  ;;  %157 = vmatmul.f32.gmra.mxu0 %v75_v31 }
  0x6f   :  { %208 = vmatmul.f32.gmra.mxu2 %v92_v32  ;;  %160 = vmatmul.f32.gmra.mxu0 %v76_v33 }
  0x77   :  { %211 = vmatmul.f32.gmra.mxu2 %v93_v34  ;;  %163 = vmatmul.f32.gmra.mxu0 %v77_v35 }
  0x7f   :  { %214 = vmatmul.f32.gmra.mxu2 %v94_v40  ;;  %166 = vmatmul.f32.gmra.mxu0 %v78_v41 }
  0x87   :  { %217 = vmatmul.f32.gmra.mxu2 %v95_v46  ;;  %169 = vmatmul.f32.gmra.mxu0 %v79_v47 }
  0x8f   :  { %220 = vmatmul.f32.gmra.mxu2 %v96_v52  ;;  %172 = vmatmul.f32.gmra.mxu0 %v80_v53 }
  0x97   :  { %223 = vmatmul.f32.gmra.mxu2 %v97_v57  ;;  %175 = vmatmul.f32.gmra.mxu0 %v81_v58 }
  0x9f   :  { %226 = vmatmul.f32.gmra.mxu2 %v98_v60  ;;  %178 = vmatmul.f32.gmra.mxu0 %v82_v61 }
  0xa7   :  { %229 = vmatmul.f32.gmra.mxu2 %v99_v62  ;;  %181 = vmatmul.f32.gmra.mxu0 %v83_v63 }
  0xac   :  { %v137_v1 = vpop.f32.mrf.mxu0 }
  0xad   :  { %v138_v2 = vadd.f32 %v649_v0, %v137_v1 }
  0xaf   :  { %v233_v3 = vmax.f32 %v138_v2, 0.0 }
  0xb1   :  { %301 = vmatmul.f32.vlgmr.msra.gmra.mxu1 %v233_v3 }
  0xb2   :  { %v185_v4 = vpop.f32.mrf.mxu2 }
  0xb3   :  { %v186_v5 = vadd.f32 %v649_v0, %v185_v4 }
  0xb4   :  { %v140_v6 = vpop.f32.mrf.mxu0 }
  0xb5   :  { %v249_v7 = vmax.f32 %v186_v5, 0.0  ;;  %v141_v8 = vadd.f32 %v649_v0, %v140_v6 }
  0xb7   :  { %349 = vmatmul.f32.vlgmr.msra.gmra.mxu3 %v249_v7  ;;  %v234_v9 = vmax.f32 %v141_v8, 0.0 }
  0xb9   :  { %304 = vmatmul.f32.gmra.mxu1 %v234_v9 }
  0xba   :  { %v188_v10 = vpop.f32.mrf.mxu2 }
  0xbb   :  { %v189_v11 = vadd.f32 %v649_v0, %v188_v10 }
  0xbc   :  { %v143_v12 = vpop.f32.mrf.mxu0 }
  0xbd   :  { %v250_v13 = vmax.f32 %v189_v11, 0.0  ;;  %v144_v14 = vadd.f32 %v649_v0, %v143_v12 }
  0xbf   :  { %352 = vmatmul.f32.gmra.mxu3 %v250_v13  ;;  %v235_v15 = vmax.f32 %v144_v14, 0.0 }
  0xc1   :  { %307 = vmatmul.f32.gmra.mxu1 %v235_v15 }
  0xc2   :  { %v191_v16 = vpop.f32.mrf.mxu2 }
  0xc3   :  { %v192_v17 = vadd.f32 %v649_v0, %v191_v16 }
  0xc4   :  { %v146_v18 = vpop.f32.mrf.mxu0 }
  0xc5   :  { %v251_v19 = vmax.f32 %v192_v17, 0.0  ;;  %v147_v20 = vadd.f32 %v649_v0, %v146_v18 }
  0xc7   :  { %355 = vmatmul.f32.gmra.mxu3 %v251_v19  ;;  %v236_v21 = vmax.f32 %v147_v20, 0.0 }
  0xc9   :  { %310 = vmatmul.f32.gmra.mxu1 %v236_v21 }
  0xca   :  { %v194_v22 = vpop.f32.mrf.mxu2 }
  0xcb   :  { %v195_v23 = vadd.f32 %v649_v0, %v194_v22 }
  0xcc   :  { %v149_v24 = vpop.f32.mrf.mxu0 }
  0xcd   :  { %v252_v25 = vmax.f32 %v195_v23, 0.0  ;;  %v150_v26 = vadd.f32 %v649_v0, %v149_v24 }
  0xcf   :  { %358 = vmatmul.f32.gmra.mxu3 %v252_v25  ;;  %v237_v27 = vmax.f32 %v150_v26, 0.0 }
  0xd1   :  { %313 = vmatmul.f32.gmra.mxu1 %v237_v27 }
  0xd2   :  { %v197_v28 = vpop.f32.mrf.mxu2 }
  0xd3   :  { %v198_v29 = vadd.f32 %v649_v0, %v197_v28 }
  0xd4   :  { %v152_v30 = vpop.f32.mrf.mxu0 }
  0xd5   :  { %v253_v31 = vmax.f32 %v198_v29, 0.0  ;;  %v153_v32 = vadd.f32 %v649_v0, %v152_v30 }
  0xd7   :  { %361 = vmatmul.f32.gmra.mxu3 %v253_v31  ;;  %v238_v33 = vmax.f32 %v153_v32, 0.0 }
  0xd9   :  { %316 = vmatmul.f32.gmra.mxu1 %v238_v33  ;;  %v686_v33 = vld [vmem:[%s730_s4] ss:$0 sm:$0xff] }
  0xda   :  { %v200_v34 = vpop.f32.mrf.mxu2 }
  0xdb   :  { %v201_v35 = vadd.f32 %v649_v0, %v200_v34 }
  0xdc   :  { %v155_v36 = vpop.f32.mrf.mxu0 }
  0xdd   :  { %v254_v37 = vmax.f32 %v201_v35, 0.0  ;;  %v156_v38 = vadd.f32 %v649_v0, %v155_v36 }
  0xdf   :  { %364 = vmatmul.f32.gmra.mxu3 %v254_v37  ;;  %v239_v39 = vmax.f32 %v156_v38, 0.0 }
  0xe1   :  { %319 = vmatmul.f32.gmra.mxu1 %v239_v39 }
  0xe2   :  { %v203_v40 = vpop.f32.mrf.mxu2 }
  0xe3   :  { %v204_v41 = vadd.f32 %v649_v0, %v203_v40 }
  0xe4   :  { %v158_v42 = vpop.f32.mrf.mxu0 }
  0xe5   :  { %v255_v43 = vmax.f32 %v204_v41, 0.0  ;;  %v159_v44 = vadd.f32 %v649_v0, %v158_v42 }
  0xe7   :  { %367 = vmatmul.f32.gmra.mxu3 %v255_v43  ;;  %v240_v45 = vmax.f32 %v159_v44, 0.0 }
  0xe9   :  { %322 = vmatmul.f32.gmra.mxu1 %v240_v45 }
  0xea   :  { %v206_v46 = vpop.f32.mrf.mxu2 }
  0xeb   :  { %v207_v47 = vadd.f32 %v649_v0, %v206_v46 }
  0xec   :  { %v161_v48 = vpop.f32.mrf.mxu0 }
  0xed   :  { %v256_v49 = vmax.f32 %v207_v47, 0.0  ;;  %v162_v50 = vadd.f32 %v649_v0, %v161_v48 }
  0xef   :  { %370 = vmatmul.f32.gmra.mxu3 %v256_v49  ;;  %v241_v51 = vmax.f32 %v162_v50, 0.0 }
  0xf1   :  { %325 = vmatmul.f32.gmra.mxu1 %v241_v51 }
  0xf2   :  { %v209_v52 = vpop.f32.mrf.mxu2 }
  0xf3   :  { %v210_v53 = vadd.f32 %v649_v0, %v209_v52 }
  0xf4   :  { %v164_v54 = vpop.f32.mrf.mxu0 }
  0xf5   :  { %v257_v55 = vmax.f32 %v210_v53, 0.0  ;;  %v165_v56 = vadd.f32 %v649_v0, %v164_v54 }
  0xf7   :  { %373 = vmatmul.f32.gmra.mxu3 %v257_v55  ;;  %v242_v57 = vmax.f32 %v165_v56, 0.0 }
  0xf9   :  { %328 = vmatmul.f32.gmra.mxu1 %v242_v57 }
  0xfa   :  { %v212_v58 = vpop.f32.mrf.mxu2 }
  0xfb   :  { %v213_v59 = vadd.f32 %v649_v0, %v212_v58 }
  0xfc   :  { %v167_v60 = vpop.f32.mrf.mxu0 }
  0xfd   :  { %v258_v61 = vmax.f32 %v213_v59, 0.0  ;;  %v168_v62 = vadd.f32 %v649_v0, %v167_v60 }
  0xff   :  { %376 = vmatmul.f32.gmra.mxu3 %v258_v61  ;;  %v243_v63 = vmax.f32 %v168_v62, 0.0 }
 0x101   :  { %331 = vmatmul.f32.gmra.mxu1 %v243_v63 }
 0x102   :  { %v215_v1 = vpop.f32.mrf.mxu2 }
 0x103   :  { %v216_v2 = vadd.f32 %v649_v0, %v215_v1 }
 0x104   :  { %v170_v3 = vpop.f32.mrf.mxu0 }
 0x105   :  { %v259_v4 = vmax.f32 %v216_v2, 0.0  ;;  %v171_v5 = vadd.f32 %v649_v0, %v170_v3 }
 0x107   :  { %379 = vmatmul.f32.gmra.mxu3 %v259_v4  ;;  %v244_v6 = vmax.f32 %v171_v5, 0.0 }
 0x109   :  { %334 = vmatmul.f32.gmra.mxu1 %v244_v6 }
 0x10a   :  { %v218_v7 = vpop.f32.mrf.mxu2 }
 0x10b   :  { %v219_v8 = vadd.f32 %v649_v0, %v218_v7 }
 0x10c   :  { %v173_v9 = vpop.f32.mrf.mxu0 }
 0x10d   :  { %v260_v10 = vmax.f32 %v219_v8, 0.0  ;;  %v174_v11 = vadd.f32 %v649_v0, %v173_v9 }
 0x10f   :  { %382 = vmatmul.f32.gmra.mxu3 %v260_v10  ;;  %v245_v12 = vmax.f32 %v174_v11, 0.0 }
 0x111   :  { %337 = vmatmul.f32.gmra.mxu1 %v245_v12 }
 0x112   :  { %v221_v13 = vpop.f32.mrf.mxu2 }
 0x113   :  { %v222_v14 = vadd.f32 %v649_v0, %v221_v13 }
 0x114   :  { %v176_v15 = vpop.f32.mrf.mxu0 }
 0x115   :  { %v261_v16 = vmax.f32 %v222_v14, 0.0  ;;  %v177_v17 = vadd.f32 %v649_v0, %v176_v15 }
 0x117   :  { %385 = vmatmul.f32.gmra.mxu3 %v261_v16  ;;  %v246_v18 = vmax.f32 %v177_v17, 0.0 }
 0x119   :  { %340 = vmatmul.f32.gmra.mxu1 %v246_v18 }
 0x11a   :  { %v224_v19 = vpop.f32.mrf.mxu2 }
 0x11b   :  { %v225_v20 = vadd.f32 %v649_v0, %v224_v19 }
 0x11c   :  { %v179_v21 = vpop.f32.mrf.mxu0 }
 0x11d   :  { %v262_v22 = vmax.f32 %v225_v20, 0.0  ;;  %v180_v23 = vadd.f32 %v649_v0, %v179_v21 }
 0x11f   :  { %388 = vmatmul.f32.gmra.mxu3 %v262_v22  ;;  %v247_v24 = vmax.f32 %v180_v23, 0.0 }
 0x121   :  { %343 = vmatmul.f32.gmra.mxu1 %v247_v24 }
 0x122   :  { %v227_v25 = vpop.f32.mrf.mxu2 }
 0x123   :  { %v228_v26 = vadd.f32 %v649_v0, %v227_v25 }
 0x124   :  { %v182_v27 = vpop.f32.mrf.mxu0 }
 0x125   :  { %v263_v28 = vmax.f32 %v228_v26, 0.0  ;;  %v183_v29 = vadd.f32 %v649_v0, %v182_v27 }
 0x127   :  { %391 = vmatmul.f32.gmra.mxu3 %v263_v28  ;;  %v248_v30 = vmax.f32 %v183_v29, 0.0 }
 0x129   :  { %346 = vmatmul.f32.gmra.mxu1 %v248_v30 }
 0x12a   :  { %v230_v31 = vpop.f32.mrf.mxu2 }
 0x12b   :  { %v231_v32 = vadd.f32 %v649_v0, %v230_v31 }
 0x12d   :  { %v264_v34 = vmax.f32 %v231_v32, 0.0 }
 0x12e   :  { %v302_v35 = vpop.f32.mrf.mxu1 }
 0x12f   :  { %394 = vmatmul.f32.gmra.mxu3 %v264_v34  ;;  %v303_v36 = vadd.f32 %v686_v33, %v302_v35 }
 0x131   :  { %398 = vst [vmem:[#allocation8] sm:$0xff] %v303_v36 }
 0x136   :  { %v305_v37 = vpop.f32.mrf.mxu1 }
 0x137   :  { %v306_v38 = vadd.f32 %v686_v33, %v305_v37 }
 0x139   :  { %399 = vst [vmem:[#allocation8 + $0x8] sm:$0xff] %v306_v38 }
 0x13a   :  { %v350_v39 = vpop.f32.mrf.mxu3 }
 0x13b   :  { %v351_v40 = vadd.f32 %v686_v33, %v350_v39 }
 0x13d   :  { %414 = vst [vmem:[#allocation8 + $0x80] sm:$0xff] %v351_v40 }
 0x13e   :  { %v308_v0 = vpop.f32.mrf.mxu1 }
 0x13f   :  { %v309_v41 = vadd.f32 %v686_v33, %v308_v0 }
 0x141   :  { %400 = vst [vmem:[#allocation8 + $0x10] sm:$0xff] %v309_v41 }
 0x142   :  { %v353_v42 = vpop.f32.mrf.mxu3 }
 0x143   :  { %v354_v43 = vadd.f32 %v686_v33, %v353_v42 }
 0x145   :  { %415 = vst [vmem:[#allocation8 + $0x88] sm:$0xff] %v354_v43 }
 0x146   :  { %v311_v44 = vpop.f32.mrf.mxu1 }
 0x147   :  { %v312_v45 = vadd.f32 %v686_v33, %v311_v44 }
 0x149   :  { %401 = vst [vmem:[#allocation8 + $0x18] sm:$0xff] %v312_v45 }
 0x14a   :  { %v356_v46 = vpop.f32.mrf.mxu3 }
 0x14b   :  { %v357_v47 = vadd.f32 %v686_v33, %v356_v46 }
 0x14d   :  { %416 = vst [vmem:[#allocation8 + $0x90] sm:$0xff] %v357_v47 }
 0x14e   :  { %v314_v48 = vpop.f32.mrf.mxu1 }
 0x14f   :  { %v315_v49 = vadd.f32 %v686_v33, %v314_v48 }
 0x151   :  { %402 = vst [vmem:[#allocation8 + $0x20] sm:$0xff] %v315_v49 }
 0x152   :  { %v359_v50 = vpop.f32.mrf.mxu3 }
 0x153   :  { %v360_v51 = vadd.f32 %v686_v33, %v359_v50 }
 0x155   :  { %417 = vst [vmem:[#allocation8 + $0x98] sm:$0xff] %v360_v51 }
 0x156   :  { %v317_v52 = vpop.f32.mrf.mxu1 }
 0x157   :  { %v318_v53 = vadd.f32 %v686_v33, %v317_v52 }
 0x159   :  { %403 = vst [vmem:[#allocation8 + $0x28] sm:$0xff] %v318_v53 }
 0x15a   :  { %v362_v54 = vpop.f32.mrf.mxu3 }
 0x15b   :  { %v363_v55 = vadd.f32 %v686_v33, %v362_v54 }
 0x15d   :  { %418 = vst [vmem:[#allocation8 + $0xa0] sm:$0xff] %v363_v55 }
 0x15e   :  { %v320_v56 = vpop.f32.mrf.mxu1 }
 0x15f   :  { %v321_v57 = vadd.f32 %v686_v33, %v320_v56 }
 0x161   :  { %404 = vst [vmem:[#allocation8 + $0x30] sm:$0xff] %v321_v57 }
 0x162   :  { %v365_v58 = vpop.f32.mrf.mxu3 }
 0x163   :  { %v366_v59 = vadd.f32 %v686_v33, %v365_v58 }
 0x165   :  { %419 = vst [vmem:[#allocation8 + $0xa8] sm:$0xff] %v366_v59 }
 0x166   :  { %v323_v60 = vpop.f32.mrf.mxu1 }
 0x167   :  { %v324_v61 = vadd.f32 %v686_v33, %v323_v60 }
 0x169   :  { %405 = vst [vmem:[#allocation8 + $0x38] sm:$0xff] %v324_v61 }
 0x16a   :  { %v368_v62 = vpop.f32.mrf.mxu3 }
 0x16b   :  { %v369_v63 = vadd.f32 %v686_v33, %v368_v62 }
 0x16d   :  { %420 = vst [vmem:[#allocation8 + $0xb0] sm:$0xff] %v369_v63 }
 0x16e   :  { %v326_v1 = vpop.f32.mrf.mxu1 }
 0x16f   :  { %v327_v2 = vadd.f32 %v686_v33, %v326_v1 }
 0x171   :  { %406 = vst [vmem:[#allocation8 + $0x40] sm:$0xff] %v327_v2 }
 0x172   :  { %v371_v3 = vpop.f32.mrf.mxu3 }
 0x173   :  { %v372_v4 = vadd.f32 %v686_v33, %v371_v3 }
 0x175   :  { %421 = vst [vmem:[#allocation8 + $0xb8] sm:$0xff] %v372_v4 }
 0x176   :  { %v329_v5 = vpop.f32.mrf.mxu1 }
 0x177   :  { %v330_v6 = vadd.f32 %v686_v33, %v329_v5 }
 0x179   :  { %407 = vst [vmem:[#allocation8 + $0x48] sm:$0xff] %v330_v6 }
 0x17a   :  { %v374_v7 = vpop.f32.mrf.mxu3 }
 0x17b   :  { %v375_v8 = vadd.f32 %v686_v33, %v374_v7 }
 0x17d   :  { %422 = vst [vmem:[#allocation8 + $0xc0] sm:$0xff] %v375_v8 }
 0x17e   :  { %v332_v9 = vpop.f32.mrf.mxu1 }
 0x17f   :  { %v333_v10 = vadd.f32 %v686_v33, %v332_v9 }
 0x181   :  { %408 = vst [vmem:[#allocation8 + $0x50] sm:$0xff] %v333_v10 }
 0x182   :  { %v377_v11 = vpop.f32.mrf.mxu3 }
 0x183   :  { %v378_v12 = vadd.f32 %v686_v33, %v377_v11 }
 0x185   :  { %423 = vst [vmem:[#allocation8 + $0xc8] sm:$0xff] %v378_v12 }
 0x186   :  { %v335_v13 = vpop.f32.mrf.mxu1 }
 0x187   :  { %v336_v14 = vadd.f32 %v686_v33, %v335_v13 }
 0x189   :  { %409 = vst [vmem:[#allocation8 + $0x58] sm:$0xff] %v336_v14 }
 0x18a   :  { %v380_v15 = vpop.f32.mrf.mxu3 }
 0x18b   :  { %v381_v16 = vadd.f32 %v686_v33, %v380_v15 }
 0x18d   :  { %424 = vst [vmem:[#allocation8 + $0xd0] sm:$0xff] %v381_v16 }
 0x18e   :  { %v338_v17 = vpop.f32.mrf.mxu1 }
 0x18f   :  { %v339_v18 = vadd.f32 %v686_v33, %v338_v17 }
 0x191   :  { %410 = vst [vmem:[#allocation8 + $0x60] sm:$0xff] %v339_v18 }
 0x192   :  { %v383_v19 = vpop.f32.mrf.mxu3 }
 0x193   :  { %v384_v20 = vadd.f32 %v686_v33, %v383_v19 }
 0x195   :  { %425 = vst [vmem:[#allocation8 + $0xd8] sm:$0xff] %v384_v20 }
 0x196   :  { %v341_v21 = vpop.f32.mrf.mxu1 }
 0x197   :  { %v342_v22 = vadd.f32 %v686_v33, %v341_v21 }
 0x199   :  { %411 = vst [vmem:[#allocation8 + $0x68] sm:$0xff] %v342_v22 }
 0x19a   :  { %v386_v23 = vpop.f32.mrf.mxu3 }
 0x19b   :  { %v387_v24 = vadd.f32 %v686_v33, %v386_v23 }
 0x19d   :  { %426 = vst [vmem:[#allocation8 + $0xe0] sm:$0xff] %v387_v24 }
 0x19e   :  { %v344_v25 = vpop.f32.mrf.mxu1 }
 0x19f   :  { %v345_v26 = vadd.f32 %v686_v33, %v344_v25 }
 0x1a1   :  { %412 = vst [vmem:[#allocation8 + $0x70] sm:$0xff] %v345_v26 }
 0x1a2   :  { %v389_v27 = vpop.f32.mrf.mxu3 }
 0x1a3   :  { %v390_v28 = vadd.f32 %v686_v33, %v389_v27 }
 0x1a5   :  { %427 = vst [vmem:[#allocation8 + $0xe8] sm:$0xff] %v390_v28 }
 0x1a6   :  { %v347_v29 = vpop.f32.mrf.mxu1 }
 0x1a7   :  { %v348_v30 = vadd.f32 %v686_v33, %v347_v29 }
 0x1a9   :  { %413 = vst [vmem:[#allocation8 + $0x78] sm:$0xff] %v348_v30 }
 0x1aa   :  { %v392_v31 = vpop.f32.mrf.mxu3 }
 0x1ab   :  { %v393_v32 = vadd.f32 %v686_v33, %v392_v31 }
 0x1ad   :  { %428 = vst [vmem:[#allocation8 + $0xf0] sm:$0xff] %v393_v32 }
 0x1b2   :  { %v395_v34 = vpop.f32.mrf.mxu3 }
 0x1b3   :  { %v396_v35 = vadd.f32 %v686_v33, %v395_v34 }
 0x1b5   :  { %429 = vst [vmem:[#allocation8 + $0xf8] sm:$0xff] %v396_v35 }
 0x1b6   :  { %433 = vsyncadd [#allocation4], 3840  ;;  %s436_s11 = sshll.u32 %s731_s5, 4  ;;  %s597_s12 = smov [#allocation8]   ;;  %s437_s11 = int_to_ptr.hbm [resolvable:$true] %s436_s11 }
 0x1b7   :  { %s434_s13 = sshll.u32 %s597_s12, 4  ;;  %s435_s13 = int_to_ptr.vmem [resolvable:$true] %s434_s13 }
 0x1b8   :  { %442 = dma.vmem_to_hbm [thread:$0]  %s435_s13, 256, %s437_s11, [#allocation4], %s593_s26, %s593_s26, %s594_s27  }
 0x1b9   :  { %590 = dma.done.wait [#allocation4], 4096  }
 0x1ba   :  { %591 = vsyncadd [#allocation4], 4294963200 }
 0x1bb   :  { %447 = vsyncpa [#allocation3], 1 }
 0x1bc   :  { %448 = vsyncpa [#allocation6], 1 }
 0x1bd   :  { %449 = vsyncpa [#allocation4], 1 }

</bundles_post_ra>
